<compile_context>
chip_gen: v7x
topology: tpu7x:2x2x1
jax: 0.10.0
libtpu: 0.0.40
codegen_flags: <defaults>
</compile_context>

<pallas_src>
import jax
import jax.numpy as jnp
from jax.experimental import pallas as pl
from jax.experimental.pallas import tpu as pltpu


def _round_up(x, m):
    return (x + m - 1) // m * m


def _choose_s_tile(C, S, itemsize, target_bytes, max_lanes):
    """Bytes-based spatial tile: ~target_bytes per (C, S_TILE) buffer, lane aligned."""
    s_pad = _round_up(S, 128)
    lanes = max(128, target_bytes // (itemsize * C))
    lanes = _round_up(min(lanes, max_lanes), 128)
    return int(min(lanes, s_pad))


def _make_kernel(C, S, S_TILE):
    """Kernel body for one (instance b, spatial tile s) grid point. Sizes static."""
    needs_mask = (S % S_TILE) != 0
    n_slices = S_TILE // 128

    def kernel(h_ref, wsal_ref, inst_ref, vmax_ref, mx_sc, r1_ref, r2_ref, r3_ref):
        s_idx = pl.program_id(1)
        n_s = pl.num_programs(1)

        h_tile = h_ref[...]                                    # (C, S_TILE)
        neg_h = jnp.array(-jnp.inf, h_tile.dtype)

        # ---- per-instance accumulator init at the first spatial tile -------
        @pl.when(s_idx == 0)
        def _():
            mx_sc[...] = jnp.full((C, 128), -jnp.inf, h_tile.dtype)
            neg_row = jnp.full((1, S_TILE), -jnp.inf, jnp.float32)
            r1_ref[...] = neg_row
            r2_ref[...] = neg_row
            r3_ref[...] = neg_row

        if needs_mask:
            lane = jax.lax.broadcasted_iota(jnp.int32, (1, S_TILE), 1)
            valid = (lane + s_idx * S_TILE) < S                # only last tile is partial

        # ---- pass A: running channel max, pure-VPU fold into (C, 128) ------
        def fold(tile):
            acc = mx_sc[...]
            for j in range(n_slices):
                acc = jnp.maximum(acc, tile[:, j * 128:(j + 1) * 128])
            mx_sc[...] = acc

        if needs_mask:
            @pl.when(s_idx < n_s - 1)
            def _():
                fold(h_tile)

            @pl.when(s_idx == n_s - 1)
            def _():
                fold(jnp.where(valid, h_tile, neg_h))
        else:
            fold(h_tile)

        # ---- pass B: saliency 1x1 conv (MXU dot over C) + sigmoid ----------
        logits = jnp.dot(wsal_ref[...], h_tile,
                         preferred_element_type=jnp.float32)   # (1, S_TILE)
        sal = jax.nn.sigmoid(logits)
        if needs_mask:
            # padded columns must never enter the top-3
            sal = jnp.where(valid, sal, -jnp.inf)

        # ---- per-lane running top-3 (elementwise sorted-triple insert) -----
        a = r1_ref[...]
        b = r2_ref[...]
        c = r3_ref[...]
        na = jnp.maximum(a, sal)
        lo = jnp.minimum(a, sal)
        nb = jnp.maximum(b, lo)
        lo2 = jnp.minimum(b, lo)
        nc = jnp.maximum(c, lo2)
        r1_ref[...] = na
        r2_ref[...] = nb
        r3_ref[...] = nc

        # ---- finalize this instance at the last spatial tile ----------------
        @pl.when(s_idx == n_s - 1)
        def _():
            # channel max: single XLU lane reduce per instance
            vmax_ref[...] = jnp.max(mx_sc[...], axis=1,
                                    keepdims=True).astype(jnp.float32)   # (C, 1)

            # global top-3 from the per-lane sorted triples (a >= b >= c per lane)
            aa = r1_ref[...]
            bb = r2_ref[...]
            cc = r3_ref[...]
            cidx = jax.lax.broadcasted_iota(jnp.int32, (1, S_TILE), 1)
            total = jnp.zeros((1, 1), jnp.float32)
            for _ in range(3):                                  # pool_patches = 3
                cur = jnp.max(aa, axis=1, keepdims=True)        # (1, 1)
                total = total + cur
                first = jnp.min(jnp.where(aa == cur, cidx, S_TILE),
                                axis=1, keepdims=True)
                hit = cidx == first                             # exactly one lane
                # shift the hit lane up so per-lane sortedness is preserved
                aa = jnp.where(hit, bb, aa)
                bb = jnp.where(hit, cc, bb)
                cc = jnp.where(hit, -jnp.inf, cc)
            inst_ref[...] = total * (1.0 / 3.0)

    return kernel


def saliency_classifier_forward(h_nchw, params, *,
                                target_tile_bytes=2 * 1024 * 1024,
                                max_tile_lanes=8192):
    """h_nchw: (B, nf, H, W) NCHW like PyTorch (f32 or bf16).
    Returns (yhat_bag, yhat_instance)."""
    w_sal, wv, bv, wu, bu, ww, bw = params
    B, C, H, W = h_nchw.shape
    S = H * W
    assert S >= 3, "top-3 pooling requires at least 3 spatial positions"

    itemsize = jnp.dtype(h_nchw.dtype).itemsize
    S_TILE = _choose_s_tile(C, S, itemsize, target_tile_bytes, max_tile_lanes)
    n_s = pl.cdiv(S, S_TILE)

    h3 = h_nchw.reshape(B, C, S)                 # free (contiguous), no cast, no pad
    wsal2 = w_sal.astype(h3.dtype)               # (1, C), tiny

    kernel = _make_kernel(C, S, S_TILE)

    inst3, vmax3 = pl.pallas_call(
        kernel,
        grid=(B, n_s),
        in_specs=[
            pl.BlockSpec((None, C, S_TILE), lambda b, s: (b, 0, s)),  # h tile
            pl.BlockSpec((1, C), lambda b, s: (0, 0)),                # w_sal (1x1 conv)
        ],
        out_specs=(
            pl.BlockSpec((None, 1, 1), lambda b, s: (b, 0, 0)),       # top-3 mean
            pl.BlockSpec((None, C, 1), lambda b, s: (b, 0, 0)),       # channel max
        ),
        out_shape=(
            jax.ShapeDtypeStruct((B, 1, 1), jnp.float32),             # yhat_instance
            jax.ShapeDtypeStruct((B, C, 1), jnp.float32),             # v = max_hw(h)
        ),
        scratch_shapes=[
            pltpu.VMEM((C, 128), h3.dtype),        # running per-lane channel max
            pltpu.VMEM((1, S_TILE), jnp.float32),  # per-lane top-1
            pltpu.VMEM((1, S_TILE), jnp.float32),  # per-lane top-2
            pltpu.VMEM((1, S_TILE), jnp.float32),  # per-lane top-3
        ],
        compiler_params=pltpu.CompilerParams(
            dimension_semantics=("parallel", "arbitrary"),
            # conservative so the same budget works on v7x's 64 MiB VMEM;
            # v5e/v6e can raise this and push target_tile_bytes larger.
            vmem_limit_bytes=32 * 1024 * 1024,
        ),
    )(h3, wsal2)

    yhat_instance = inst3[:, 0, 0]                               # (B,)
    v = vmax3[:, :, 0]                                           # (B, C) f32

    # Gated-attention head + tiny O(B) cross-batch reduction stay in XLA so the
    # B grid axis stays "parallel" and (L, C) weights never occupy kernel VMEM.
    a_v = jnp.tanh(v @ wv.T + bv)                                # (B, L)
    a_u = jax.nn.sigmoid(v @ wu.T + bu)                          # (B, L)
    scores = (a_v * a_u) @ ww.T + bw + 1e-7                      # (B, 1)
    att = jax.nn.softmax(scores[:, 0], axis=0)
    yhat_bag = jnp.clip(jnp.sum(att * yhat_instance), 1e-6, 1.0 - 1e-6)
    return yhat_bag, yhat_instance


def reference_forward(h_nchw, params):
    """Pure-JAX reference of the PyTorch forward, for correctness checking."""
    w_sal, wv, bv, wu, bu, ww, bw = params
    B, C, H, W = h_nchw.shape
    sal = jax.nn.sigmoid(jnp.einsum('bchw,oc->bohw', h_nchw, w_sal,
                                    precision=jax.lax.Precision.HIGHEST))[:, 0]
    flat = sal.reshape(B, H * W)
    top3 = jax.lax.top_k(flat, 3)[0]
    yhat_inst = top3.mean(axis=1)                                # (B,)
    v = h_nchw.max(axis=(2, 3))                                  # (B, nf)
    a_v = jnp.tanh(v @ wv.T + bv)
    a_u = jax.nn.sigmoid(v @ wu.T + bu)
    scores = (a_v * a_u) @ ww.T + bw + 1e-7                      # (B, 1)
    att = jax.nn.softmax(scores[:, 0], axis=0)
    bag = jnp.clip(jnp.sum(att * yhat_inst), 1e-6, 1.0 - 1e-6)
    return bag, yhat_inst


def init_params(key, nf, L, num_classes=1):
    """Deterministic synthetic parameters with PyTorch-native shapes (num_classes=1)."""
    ks = jax.random.split(key, 7)
    s_nf = 1.0 / jnp.sqrt(nf)
    s_L = 1.0 / jnp.sqrt(L)
    w_sal = jax.random.uniform(ks[0], (num_classes, nf), jnp.float32, -s_nf, s_nf)
    wv = jax.random.uniform(ks[1], (L, nf), jnp.float32, -s_nf, s_nf)
    bv = jax.random.uniform(ks[2], (L,), jnp.float32, -s_nf, s_nf)
    wu = jax.random.uniform(ks[3], (L, nf), jnp.float32, -s_nf, s_nf)
    bu = jax.random.uniform(ks[4], (L,), jnp.float32, -s_nf, s_nf)
    ww = jax.random.uniform(ks[5], (num_classes, L), jnp.float32, -s_L, s_L)
    bw = jax.random.uniform(ks[6], (num_classes,), jnp.float32, -s_L, s_L)
    return (w_sal, wv, bv, wu, bu, ww, bw)


if __name__ == "__main__":
    B, nf, H, W, L = 2, 4, 16, 16, 32
    key = jax.random.PRNGKey(0)
    k_h, k_p = jax.random.split(key)
    h = jax.random.normal(k_h, (B, nf, H, W), jnp.float32)   # NCHW, like PyTorch
    params = init_params(k_p, nf, L)

    forward = jax.jit(saliency_classifier_forward)
    yhat_bag, yhat_instance = forward(h, params)
    jax.block_until_ready((yhat_bag, yhat_instance))

    ref_bag, ref_inst = reference_forward(h, params)
    # Tolerance covers MXU pass-count differences between Mosaic's f32 dot and
    # XLA's einsum for the saliency logits; the channel-max / attention path is exact.
    assert jnp.allclose(yhat_instance, ref_inst, atol=1e-2, rtol=1e-2), (yhat_instance, ref_inst)
    assert jnp.allclose(yhat_bag, ref_bag, atol=1e-2, rtol=1e-2), (yhat_bag, ref_bag)

    print("KERNEL_OK")
</pallas_src>

<mosaic_0001>
module attributes {stable_mosaic.version = 11 : i64} {
  func.func @kernel(%arg0: i32, %arg1: i32, %arg2: memref<1x4x256xf32, #tpu.memory_space<vmem>>, %arg3: memref<1x4xf32, #tpu.memory_space<vmem>>, %arg4: memref<1x1x1xf32, #tpu.memory_space<vmem>>, %arg5: memref<1x4x1xf32, #tpu.memory_space<vmem>>, %arg6: memref<4x128xf32, #tpu.memory_space<vmem>>, %arg7: memref<1x256xf32, #tpu.memory_space<vmem>>, %arg8: memref<1x256xf32, #tpu.memory_space<vmem>>, %arg9: memref<1x256xf32, #tpu.memory_space<vmem>>) attributes {dimension_semantics = [#tpu.dimension_semantics<parallel>, #tpu.dimension_semantics<arbitrary>], iteration_bounds = array<i64: 2, 1>, scalar_prefetch = 0 : i64, scratch_operands = 4 : i64, tpu.core_type = #tpu.core_type<tc>, window_params = [{transform_indices = @transform_0, window_bounds = array<i64: 1, 4, 256>}, {pipeline_mode = #tpu.pipeline_mode<synchronous>, transform_indices = @transform_1, window_bounds = array<i64: 1, 4>}, {transform_indices = @transform_2, window_bounds = array<i64: 1, 1, 1>}, {transform_indices = @transform_3, window_bounds = array<i64: 1, 4, 1>}]} {
    %c0 = arith.constant 0 : index
    %c0_0 = arith.constant 0 : index
    %c0_1 = arith.constant 0 : index
    %0 = vector.load %arg2[%c0, %c0_0, %c0_1] : memref<1x4x256xf32, #tpu.memory_space<vmem>>, vector<1x4x256xf32>
    %1 = vector.shape_cast %0 : vector<1x4x256xf32> to vector<4x256xf32>
    %c0_i32 = arith.constant 0 : i32
    %2 = arith.cmpi eq, %arg1, %c0_i32 : i32
    %3 = arith.extui %2 : i1 to i32
    %c0_i32_2 = arith.constant 0 : i32
    %4 = arith.cmpi ne, %3, %c0_i32_2 : i32
    scf.if %4 {
      %cst_24 = arith.constant 0xFF800000 : f32
      %32 = vector.broadcast %cst_24 : f32 to vector<4x128xf32>
      %c0_25 = arith.constant 0 : index
      %c0_26 = arith.constant 0 : index
      %33 = vector.load %arg6[%c0_25, %c0_26] : memref<4x128xf32, #tpu.memory_space<vmem>>, vector<4x128xf32>
      tpu.vector_store %arg6[%c0_25, %c0_26], %32 {strides = array<i32>} : memref<4x128xf32, #tpu.memory_space<vmem>>, vector<4x128xf32>,
      %cst_27 = arith.constant 0xFF800000 : f32
      %34 = vector.broadcast %cst_27 : f32 to vector<1x256xf32>
      %c0_28 = arith.constant 0 : index
      %c0_29 = arith.constant 0 : index
      %35 = vector.load %arg7[%c0_28, %c0_29] : memref<1x256xf32, #tpu.memory_space<vmem>>, vector<1x256xf32>
      tpu.vector_store %arg7[%c0_28, %c0_29], %34 {strides = array<i32>} : memref<1x256xf32, #tpu.memory_space<vmem>>, vector<1x256xf32>,
      %c0_30 = arith.constant 0 : index
      %c0_31 = arith.constant 0 : index
      %36 = vector.load %arg8[%c0_30, %c0_31] : memref<1x256xf32, #tpu.memory_space<vmem>>, vector<1x256xf32>
      tpu.vector_store %arg8[%c0_30, %c0_31], %34 {strides = array<i32>} : memref<1x256xf32, #tpu.memory_space<vmem>>, vector<1x256xf32>,
      %c0_32 = arith.constant 0 : index
      %c0_33 = arith.constant 0 : index
      %37 = vector.load %arg9[%c0_32, %c0_33] : memref<1x256xf32, #tpu.memory_space<vmem>>, vector<1x256xf32>
      tpu.vector_store %arg9[%c0_32, %c0_33], %34 {strides = array<i32>} : memref<1x256xf32, #tpu.memory_space<vmem>>, vector<1x256xf32>,
    } else {
    }
    %c0_3 = arith.constant 0 : index
    %c0_4 = arith.constant 0 : index
    %5 = vector.load %arg6[%c0_3, %c0_4] : memref<4x128xf32, #tpu.memory_space<vmem>>, vector<4x128xf32>
    %6 = vector.extract_strided_slice %1 {offsets = [0, 0], sizes = [4, 128], strides = [1, 1]} : vector<4x256xf32> to vector<4x128xf32>
    %7 = arith.maximumf %5, %6 : vector<4x128xf32>
    %8 = vector.extract_strided_slice %1 {offsets = [0, 128], sizes = [4, 128], strides = [1, 1]} : vector<4x256xf32> to vector<4x128xf32>
    %9 = arith.maximumf %7, %8 : vector<4x128xf32>
    %c0_5 = arith.constant 0 : index
    %c0_6 = arith.constant 0 : index
    %10 = vector.load %arg6[%c0_5, %c0_6] : memref<4x128xf32, #tpu.memory_space<vmem>>, vector<4x128xf32>
    tpu.vector_store %arg6[%c0_5, %c0_6], %9 {strides = array<i32>} : memref<4x128xf32, #tpu.memory_space<vmem>>, vector<4x128xf32>,
    %c0_7 = arith.constant 0 : index
    %c0_8 = arith.constant 0 : index
    %11 = vector.load %arg3[%c0_7, %c0_8] : memref<1x4xf32, #tpu.memory_space<vmem>>, vector<1x4xf32>
    %cst = arith.constant dense<0.000000e+00> : vector<1x256xf32>
    %12 = tpu.matmul %11, %1, %cst {dimension_numbers = #tpu.dot_dimension_numbers<[1], [0], [0], [1], [0, 0, 1, 1], [], []>} : vector<1x4xf32>, vector<4x256xf32>, vector<1x256xf32> -> vector<1x256xf32>
    %13 = arith.negf %12 : vector<1x256xf32>
    %14 = math.exp %13 : vector<1x256xf32>
    %cst_9 = arith.constant 1.000000e+00 : f32
    %15 = vector.broadcast %cst_9 : f32 to vector<1x256xf32>
    %16 = arith.addf %15, %14 : vector<1x256xf32>
    %17 = arith.divf %15, %16 : vector<1x256xf32>
    %c0_10 = arith.constant 0 : index
    %c0_11 = arith.constant 0 : index
    %18 = vector.load %arg7[%c0_10, %c0_11] : memref<1x256xf32, #tpu.memory_space<vmem>>, vector<1x256xf32>
    %c0_12 = arith.constant 0 : index
    %c0_13 = arith.constant 0 : index
    %19 = vector.load %arg8[%c0_12, %c0_13] : memref<1x256xf32, #tpu.memory_space<vmem>>, vector<1x256xf32>
    %c0_14 = arith.constant 0 : index
    %c0_15 = arith.constant 0 : index
    %20 = vector.load %arg9[%c0_14, %c0_15] : memref<1x256xf32, #tpu.memory_space<vmem>>, vector<1x256xf32>
    %21 = arith.maximumf %18, %17 : vector<1x256xf32>
    %22 = arith.minimumf %18, %17 : vector<1x256xf32>
    %23 = arith.maximumf %19, %22 : vector<1x256xf32>
    %24 = arith.minimumf %19, %22 : vector<1x256xf32>
    %25 = arith.maximumf %20, %24 : vector<1x256xf32>
    %c0_16 = arith.constant 0 : index
    %c0_17 = arith.constant 0 : index
    %26 = vector.load %arg7[%c0_16, %c0_17] : memref<1x256xf32, #tpu.memory_space<vmem>>, vector<1x256xf32>
    tpu.vector_store %arg7[%c0_16, %c0_17], %21 {strides = array<i32>} : memref<1x256xf32, #tpu.memory_space<vmem>>, vector<1x256xf32>,
    %c0_18 = arith.constant 0 : index
    %c0_19 = arith.constant 0 : index
    %27 = vector.load %arg8[%c0_18, %c0_19] : memref<1x256xf32, #tpu.memory_space<vmem>>, vector<1x256xf32>
    tpu.vector_store %arg8[%c0_18, %c0_19], %23 {strides = array<i32>} : memref<1x256xf32, #tpu.memory_space<vmem>>, vector<1x256xf32>,
    %c0_20 = arith.constant 0 : index
    %c0_21 = arith.constant 0 : index
    %28 = vector.load %arg9[%c0_20, %c0_21] : memref<1x256xf32, #tpu.memory_space<vmem>>, vector<1x256xf32>
    tpu.vector_store %arg9[%c0_20, %c0_21], %25 {strides = array<i32>} : memref<1x256xf32, #tpu.memory_space<vmem>>, vector<1x256xf32>,
    %c0_i32_22 = arith.constant 0 : i32
    %29 = arith.cmpi eq, %arg1, %c0_i32_22 : i32
    %30 = arith.extui %29 : i1 to i32
    %c0_i32_23 = arith.constant 0 : i32
    %31 = arith.cmpi ne, %30, %c0_i32_23 : i32
    scf.if %31 {
      %c0_24 = arith.constant 0 : index
      %c0_25 = arith.constant 0 : index
      %32 = vector.load %arg6[%c0_24, %c0_25] : memref<4x128xf32, #tpu.memory_space<vmem>>, vector<4x128xf32>
      %cst_26 = arith.constant dense<0xFF800000> : vector<4xf32>
      %33 = vector.multi_reduction <maximumf>, %32, %cst_26 [1] : vector<4x128xf32> to vector<4xf32>
      %34 = vector.shape_cast %33 : vector<4xf32> to vector<4x1xf32>
      %c0_27 = arith.constant 0 : index
      %c0_28 = arith.constant 0 : index
      %c0_29 = arith.constant 0 : index
      %35 = vector.load %arg5[%c0_27, %c0_28, %c0_29] : memref<1x4x1xf32, #tpu.memory_space<vmem>>, vector<1x4x1xf32>
      %36 = vector.shape_cast %35 : vector<1x4x1xf32> to vector<4x1xf32>
      %37 = vector.shape_cast %34 : vector<4x1xf32> to vector<1x4x1xf32>
      tpu.vector_store %arg5[%c0_27, %c0_28, %c0_29], %37 {strides = array<i32>} : memref<1x4x1xf32, #tpu.memory_space<vmem>>, vector<1x4x1xf32>,
      %c0_30 = arith.constant 0 : index
      %c0_31 = arith.constant 0 : index
      %38 = vector.load %arg7[%c0_30, %c0_31] : memref<1x256xf32, #tpu.memory_space<vmem>>, vector<1x256xf32>
      %c0_32 = arith.constant 0 : index
      %c0_33 = arith.constant 0 : index
      %39 = vector.load %arg8[%c0_32, %c0_33] : memref<1x256xf32, #tpu.memory_space<vmem>>, vector<1x256xf32>
      %c0_34 = arith.constant 0 : index
      %c0_35 = arith.constant 0 : index
      %40 = vector.load %arg9[%c0_34, %c0_35] : memref<1x256xf32, #tpu.memory_space<vmem>>, vector<1x256xf32>
      %41 = tpu.iota {dimensions = array<i32: 1>} : vector<1x256xi32>
      %cst_36 = arith.constant 0.000000e+00 : f32
      %42 = vector.broadcast %cst_36 : f32 to vector<1x1xf32>
      %cst_37 = arith.constant dense<0xFF800000> : vector<1xf32>
      %43 = vector.multi_reduction <maximumf>, %38, %cst_37 [1] : vector<1x256xf32> to vector<1xf32>
      %44 = vector.shape_cast %43 : vector<1xf32> to vector<1x1xf32>
      %45 = arith.addf %42, %44 : vector<1x1xf32>
      %46 = vector.broadcast %44 : vector<1x1xf32> to vector<1x256xf32>
      %47 = arith.cmpf oeq, %38, %46 : vector<1x256xf32>
      %c256_i32 = arith.constant 256 : i32
      %48 = vector.broadcast %c256_i32 : i32 to vector<1x256xi32>
      %49 = arith.select %47, %41, %48 : vector<1x256xi1>, vector<1x256xi32>
      %cst_38 = arith.constant dense<2147483647> : vector<1xi32>
      %50 = vector.multi_reduction <minsi>, %49, %cst_38 [1] : vector<1x256xi32> to vector<1xi32>
      %51 = vector.shape_cast %50 : vector<1xi32> to vector<1x1xi32>
      %52 = vector.broadcast %51 : vector<1x1xi32> to vector<1x256xi32>
      %53 = arith.cmpi eq, %41, %52 : vector<1x256xi32>
      %54 = arith.select %53, %39, %38 : vector<1x256xi1>, vector<1x256xf32>
      %55 = arith.select %53, %40, %39 : vector<1x256xi1>, vector<1x256xf32>
      %cst_39 = arith.constant dense<0xFF800000> : vector<1xf32>
      %56 = vector.multi_reduction <maximumf>, %54, %cst_39 [1] : vector<1x256xf32> to vector<1xf32>
      %57 = vector.shape_cast %56 : vector<1xf32> to vector<1x1xf32>
      %58 = arith.addf %45, %57 : vector<1x1xf32>
      %59 = vector.broadcast %57 : vector<1x1xf32> to vector<1x256xf32>
      %60 = arith.cmpf oeq, %54, %59 : vector<1x256xf32>
      %c256_i32_40 = arith.constant 256 : i32
      %61 = vector.broadcast %c256_i32_40 : i32 to vector<1x256xi32>
      %62 = arith.select %60, %41, %61 : vector<1x256xi1>, vector<1x256xi32>
      %cst_41 = arith.constant dense<2147483647> : vector<1xi32>
      %63 = vector.multi_reduction <minsi>, %62, %cst_41 [1] : vector<1x256xi32> to vector<1xi32>
      %64 = vector.shape_cast %63 : vector<1xi32> to vector<1x1xi32>
      %65 = vector.broadcast %64 : vector<1x1xi32> to vector<1x256xi32>
      %66 = arith.cmpi eq, %41, %65 : vector<1x256xi32>
      %67 = arith.select %66, %55, %54 : vector<1x256xi1>, vector<1x256xf32>
      %cst_42 = arith.constant dense<0xFF800000> : vector<1xf32>
      %68 = vector.multi_reduction <maximumf>, %67, %cst_42 [1] : vector<1x256xf32> to vector<1xf32>
      %69 = vector.shape_cast %68 : vector<1xf32> to vector<1x1xf32>
      %70 = arith.addf %58, %69 : vector<1x1xf32>
      %cst_43 = arith.constant 0.333333343 : f32
      %71 = vector.broadcast %cst_43 : f32 to vector<1x1xf32>
      %72 = arith.mulf %70, %71 : vector<1x1xf32>
      %c0_44 = arith.constant 0 : index
      %c0_45 = arith.constant 0 : index
      %c0_46 = arith.constant 0 : index
      %73 = vector.load %arg4[%c0_44, %c0_45, %c0_46] : memref<1x1x1xf32, #tpu.memory_space<vmem>>, vector<1x1x1xf32>
      %74 = vector.shape_cast %73 : vector<1x1x1xf32> to vector<1x1xf32>
      %75 = vector.shape_cast %72 : vector<1x1xf32> to vector<1x1x1xf32>
      tpu.vector_store %arg4[%c0_44, %c0_45, %c0_46], %75 {strides = array<i32>} : memref<1x1x1xf32, #tpu.memory_space<vmem>>, vector<1x1x1xf32>,
    } else {
    }
    return
  }
  func.func @transform_0(%arg0: i32, %arg1: i32) -> (i32, i32, i32) {
    %c0_i32 = arith.constant 0 : i32
    %c0_i32_0 = arith.constant 0 : i32
    return %arg0, %c0_i32, %arg1 : i32, i32, i32
  }
  func.func @transform_1(%arg0: i32, %arg1: i32) -> (i32, i32) {
    %c0_i32 = arith.constant 0 : i32
    %c0_i32_0 = arith.constant 0 : i32
    %c0_i32_1 = arith.constant 0 : i32
    return %c0_i32, %c0_i32_0 : i32, i32
  }
  func.func @transform_2(%arg0: i32, %arg1: i32) -> (i32, i32, i32) {
    %c0_i32 = arith.constant 0 : i32
    %c0_i32_0 = arith.constant 0 : i32
    %c0_i32_1 = arith.constant 0 : i32
    return %arg0, %c0_i32, %c0_i32_0 : i32, i32, i32
  }
  func.func @transform_3(%arg0: i32, %arg1: i32) -> (i32, i32, i32) {
    %c0_i32 = arith.constant 0 : i32
    %c0_i32_0 = arith.constant 0 : i32
    %c0_i32_1 = arith.constant 0 : i32
    return %arg0, %c0_i32, %c0_i32_0 : i32, i32, i32
  }
}

</mosaic_0001>

<bundles_post_ra>
// kernel: saliency_classifier_forward.1
= control target key start
LH: loop header
LB: loop body
LE: loop exit
PB: predicated region body
PF: predicated region fallthrough
CT: control target
= control target key end

     0   :  { %s693_s12 = smov 0   ;;  %s695_s13 = smov 0   ;;  %s786_s0 = inlined_call_operand.vmem [shape: f32[2,4,256], index: 0, kind: input, shape index: {}]   ;;  %s787_s1 = inlined_call_operand.vmem [shape: f32[1,4], index: 1, kind: input, shape index: {}]   ;;  %s788_s2 = inlined_call_operand.vmem [shape: f32[2,1,1], index: 2, kind: output, shape index: {0}]   ;;  %s789_s3 = inlined_call_operand.vmem [shape: f32[2,4,1], index: 3, kind: output, shape index: {1}]  }
   0x1   :  { %s697_s14 = smov 0  }
   0x2 LB: > { %s26_s15 = sadd.s32 1, %s664_s13  ;;  %p599_p0 = scmp.ge.s32.totalorder %s668_s14, 1  ;;  %s668_s14 = sphi %s697_s14, %s14_s14   ;;  %s664_s13 = sphi %s695_s13, %s793_s13   ;;  %s660_s12 = sphi %s693_s12, %s792_s12  }
   0x3   : > { %p28_p1 = scmp.ge.s32.totalorder %s26_s15, 2  ;;  %p159_p2 = scmp.lt.s32.totalorder %s668_s14, 3 }
   0x5   : > { %s795_s15 = smov (%p28_p1, %s26_s15), 0  ;;  %p160_p3 = pnand %p599_p0, %p159_p2 }
   0x6   : > { %p190_p4 = scmp.lt.s32.totalorder (!%p160_p3), %s660_s12, 1  ;;  %v212_v0 = vlaneseq (!%p160_p3)  ;;  %v670_v1 = vmov (!%p160_p3), -inf   ;;  %v671_v2 = vmov (!%p160_p3), 0.0   ;;  %vm231_vm1 = vcmask (!%p160_p3), 1043456   ;;  %v226_v7 = vld [vmem:[%s787_s1] sm:$0x1] (!%p160_p3) }
   0x7   : > { %163 = sbr.rel (%p160_p3) target bundleno = 1325 (0x52d), region = 28  ;;  %211 = vst [vmem:[#allocation2] sm:$0xf] (!%p160_p3), %v670_v1  ;;  %300 = vmatprep.mubr.f32.mxu0 (!%p160_p3), %v671_v2  ;;  %vm227_vm2 = vcmask (!%p160_p3), 31744   ;;  %v672_v18 = vmov (!%p160_p3), 1966171168  }
   0x8   : > { %vm714_vm0 = vcmp.lt.s32.totalorder (!%p160_p3), %v212_v0, 256  ;;  %v326_v19 = vunpack.c.l.s4 (!%p160_p3), %v672_v18  ;;  %v329_v21 = vshrl.u32 (!%p160_p3), %v212_v0, 7  ;;  %vm378_vm3 = vcmask (!%p160_p3), 1040384  }
   0x9   : > { %216 = vst.msk [vmem:[#allocation3] sm:$0x3] (!%p160_p3), %vm714_vm0, %v670_v1  ;;  %217 = vst.msk [vmem:[#allocation4] sm:$0x3] (!%p160_p3), %vm714_vm0, %v670_v1  ;;  %v743_v44 = vand.u32 (!%p160_p3), 127, %v212_v0  ;;  %vm359_vm15 = vcmask (!%p160_p3), 3072  }
   0xa   : > { %218 = vst.msk [vmem:[#allocation5] sm:$0x3] (!%p160_p3), %vm714_vm0, %v670_v1  ;;  %v327_v20 = vunpack.c.0.s8 (!%p160_p3), %v326_v19  ;;  %v370_v36 = vsub.s32 (!%p160_p3), 0, %v329_v21  ;;  %v374_v37 = vsub.s32 (!%p160_p3), 1, %v329_v21 }
   0xb   : > { %v746_v45 = vadd.s32 (!%p160_p3), 128, %v743_v44 }
   0xc   : > { %v330_v23 = vsub.s32 (!%p160_p3), %v327_v20, %v329_v21 }
   0xd   : > { %v392_v46 = vcombine.low (!%p160_p3), %v743_v44, %v746_v45 }
   0xe   : > { %s797_s12 = smov (!%p190_p4, %s660_s12), 1  ;;  %v219_v6 = vld [vmem:[#allocation2] sm:$0xf] }
   0xf   : > { %s610_s16 = sshll.u32 %s797_s12, 3  ;;  %v399_v47 = vrot.slane %v392_v46, %v330_v23  ;;  %s602_s22 = sshll.u32 %s797_s12, 2 }
  0x10   : > { %s197_s19 = scalar_lea.vmem %s786_s0, %s610_s16  ;;  %v319_v27 = vld [vmem:[#allocation3] sm:$0x3]  ;;  %v320_v29 = vld [vmem:[#allocation4] sm:$0x3]  ;;  %s205_s25 = scalar_lea.vmem %s789_s3, %s602_s22 }
  0x11   : > { %v206_v4 = vld [vmem:[%s197_s19] sm:$0xff]  ;;  %v321_v32 = vld [vmem:[#allocation5] sm:$0x3]  ;;  %v406_v48 = vrot.slane %v399_v47, %v330_v23  ;;  %s201_s28 = scalar_lea.vmem %s788_s2, %s797_s12 }
  0x12   : > { %v222_v5 = vcombine.high %v206_v4, %v206_v4  ;;  %v220_v8 = vmax.f32 %v219_v6, %v206_v4 }
  0x14   : > { %603 = vmatprep.subr.msk.mxu0 %vm231_vm1, %v222_v5  ;;  %v224_v9 = vmax.f32 %v220_v8, %v222_v5 }
  0x15   : > { %604 = vmatpush1.msk.msra.mxu0 %vm231_vm1, %v206_v4 }
  0x16   : > { %605 = vmatmul.mubr.msk.f32.vlgmr.msra.gmra.mrb[0].mxu0 %vm227_vm2, %v226_v7  ;;  %225 = vst [vmem:[#allocation2] sm:$0xf] %v224_v9 }
  0xe9   : > { %v302_v10 = vpop.f32.mrb[0].mxu0 }
  0xea   : > { %v606_v11 = vmul.f32 -1.442695, %v302_v10  ;;  %v304_v12 = vpop.f32.mrb[1].mxu0 }
  0xeb   : > { %v607_v13 = vmul.f32 -1.442695, %v304_v12 }
  0xec   : > { %638 = vpow2.f32 %v606_v11 }
  0xed   : > { %640 = vpow2.f32 %v607_v13 }
  0xf6   : > { %v639_v14 = vpop.eup %638 }
  0xf7   : > { %v641_v15 = vpop.eup %640  ;;  %v313_v16 = vadd.f32 1.0, %v639_v14 }
  0xf8   : > { %v314_v17 = vadd.f32 1.0, %v641_v15 }
  0xf9   : > { %642 = vrcp.f32 %v313_v16 }
  0xfa   : > { %644 = vrcp.f32 %v314_v17 }
 0x103   : > { %v643_v22 = vpop.eup %642 }
 0x104   : > { %v645_v24 = vpop.eup %644 }
 0x105   : > { %v324_v25 = vcombine.low %v643_v22, %v645_v24 }
 0x107   : > { %v331_v26 = vrot.slane %v324_v25, %v330_v23 }
 0x109   : > { %v338_v28 = vrot.slane %v331_v26, %v330_v23 }
 0x10b   : > { %v340_v30 = vmax.f32 %v319_v27, %v338_v28  ;;  %v341_v31 = vmin.f32 %v319_v27, %v338_v28 }
 0x10d   : > { %v342_v33 = vmax.f32 %v320_v29, %v341_v31  ;;  %v343_v34 = vmin.f32 %v320_v29, %v341_v31  ;;  %349 = vst.msk [vmem:[#allocation3] sm:$0x3] %vm714_vm0, %v340_v30  ;;  %v355_v29 = vld [vmem:[#allocation2] sm:$0xf] }
 0x10e   : > { %v356_v30 = vsel %vm231_vm1, %v355_v29, -inf }
 0x10f   : > { %v344_v35 = vmax.f32 %v321_v32, %v343_v34  ;;  %350 = vst.msk [vmem:[#allocation4] sm:$0x3] %vm714_vm0, %v342_v33 }
 0x111   : > { %351 = vst.msk [vmem:[#allocation5] sm:$0x3] %vm714_vm0, %v344_v35  ;;  %vm501_vm0 = vcmask 0  }
 0x114   : > { %v361_v38 = vld [vmem:[#allocation3] sm:$0x3] }
 0x115   : > { %v371_v39 = vrot.slane %v361_v38, %v370_v36  ;;  %v375_v40 = vrot.slane %v361_v38, %v374_v37 }
 0x116   : > { %v362_v3 = vld [vmem:[#allocation4] sm:$0x3] }
 0x117   : > { %v379_v41 = vsel %vm378_vm3, %v371_v39, -inf  ;;  %v380_v42 = vsel %vm378_vm3, %v375_v40, -inf  ;;  %v440_v6 = vrot.slane %v362_v3, %v370_v36  ;;  %v444_v7 = vrot.slane %v362_v3, %v374_v37 }
 0x118   : > { %v381_v43 = vmax.f32 %v379_v41, %v380_v42  ;;  %v363_v4 = vld [vmem:[#allocation5] sm:$0x3] }
 0x119   : > { %v453_v8 = vrot.slane %v363_v4, %v370_v36  ;;  %v457_v9 = vrot.slane %v363_v4, %v374_v37 }
 0x11a   : > { %382 = vmax.xlane.f32.xlu0 %v381_v43 }
 0x1a7   : > { %v750_v49 = vpop.xlane.xlu0 %382 }
 0x1a8   : > { %v389_v50 = vrot.slane %v750_v49, %v370_v36 }
 0x1aa   : > { %vm391_vm4 = vcmp.eq.f32.partialorder %v361_v38, %v389_v50 }
 0x1ab   : > { %v407_v51 = vsel %vm391_vm4, %v406_v48, 256 }
 0x1ac   : > { %v411_v52 = vrot.slane %v407_v51, %v370_v36  ;;  %v415_v53 = vrot.slane %v407_v51, %v374_v37 }
 0x1ae   : > { %v416_v54 = vsel %vm378_vm3, %v411_v52, 2147483647  ;;  %v417_v55 = vsel %vm378_vm3, %v415_v53, 2147483647 }
 0x1af   : > { %vm418_vm5 = vcmp.lt.s32.totalorder %v416_v54, %v417_v55 }
 0x1b0   : > { %v419_v56 = vsel %vm418_vm5, %v416_v54, %v417_v55 }
 0x1b1   : > { %v421_v57 = vshra.s32 %v419_v56, 16  ;;  %v420_v59 = vand.u32 65535, %v419_v56 }
 0x1b3   : > { %v423_v58 = vcvt.s32.f32 %v421_v57  ;;  %v422_v61 = vcvt.s32.f32 %v420_v59 }
 0x1b5   : > { %424 = vmin.xlane.f32.xlu0 %v423_v58 }
 0x242   : > { %v425_v60 = vpop.xlane.xlu0 %424 }
 0x243   : > { %vm426_vm6 = vcmp.eq.f32.partialorder %v423_v58, %v425_v60  ;;  %v431_v63 = vcvt.f32.s32 %v425_v60 }
 0x244   : > { %v427_v62 = vsel %vm426_vm6, %v422_v61, inf }
 0x245   : > { %428 = vmin.xlane.f32.xlu1 %v427_v62  ;;  %v432_v1 = vshll.u32 %v431_v63, 16 }
 0x2d2   : > { %v429_v0 = vpop.xlane.xlu1 %428 }
 0x2d3   : > { %v430_v2 = vcvt.f32.s32 %v429_v0 }
 0x2d5   : > { %v433_v5 = vadd.s32 %v432_v1, %v430_v2 }
 0x2d7   : > { %vm434_vm7 = vcmp.eq.s32.totalorder %v743_v44, %v433_v5  ;;  %vm435_vm8 = vcmp.eq.s32.totalorder %v746_v45, %v433_v5 }
 0x2d8   : > { %v447_v10 = vsel %vm434_vm7, %v440_v6, %v371_v39  ;;  %v448_v11 = vsel %vm435_vm8, %v444_v7, %v375_v40  ;;  %v460_v12 = vsel %vm434_vm7, %v453_v8, %v440_v6  ;;  %v461_v13 = vsel %vm435_vm8, %v457_v9, %v444_v7 }
 0x2d9   : > { %v462_v14 = vsel %vm378_vm3, %v447_v10, -inf  ;;  %v463_v15 = vsel %vm378_vm3, %v448_v11, -inf }
 0x2da   : > { %v464_v16 = vmax.f32 %v462_v14, %v463_v15 }
 0x2dc   : > { %465 = vmax.xlane.f32.xlu1 %v464_v16 }
 0x369   : > { %v466_v17 = vpop.xlane.xlu1 %465 }
 0x36a   : > { %vm468_vm9 = vcmp.eq.f32.partialorder %v447_v10, %v466_v17  ;;  %vm469_vm10 = vcmp.eq.f32.partialorder %v448_v11, %v466_v17  ;;  %v467_v42 = vadd.f32 %v466_v17, %v750_v49 }
 0x36b   : > { %v470_v18 = vsel %vm468_vm9, %v743_v44, 256  ;;  %v471_v19 = vsel %vm469_vm10, %v746_v45, 256 }
 0x36c   : > { %v472_v20 = vsel %vm378_vm3, %v470_v18, 2147483647  ;;  %v473_v21 = vsel %vm378_vm3, %v471_v19, 2147483647 }
 0x36d   : > { %vm474_vm11 = vcmp.lt.s32.totalorder %v472_v20, %v473_v21 }
 0x36e   : > { %v475_v22 = vsel %vm474_vm11, %v472_v20, %v473_v21 }
 0x36f   : > { %v477_v23 = vshra.s32 %v475_v22, 16  ;;  %v476_v25 = vand.u32 65535, %v475_v22 }
 0x371   : > { %v479_v24 = vcvt.s32.f32 %v477_v23  ;;  %v478_v27 = vcvt.s32.f32 %v476_v25 }
 0x373   : > { %480 = vmin.xlane.f32.xlu0 %v479_v24 }
 0x400   : > { %v481_v26 = vpop.xlane.xlu0 %480 }
 0x401   : > { %vm482_vm12 = vcmp.eq.f32.partialorder %v479_v24, %v481_v26  ;;  %v487_v31 = vcvt.f32.s32 %v481_v26 }
 0x402   : > { %v483_v28 = vsel %vm482_vm12, %v478_v27, inf }
 0x403   : > { %484 = vmin.xlane.f32.xlu1 %v483_v28  ;;  %v488_v33 = vshll.u32 %v487_v31, 16 }
 0x407   : > { %357 = vmax.xlane.f32.xlu1 %v356_v30 }
 0x490   : > { %v485_v32 = vpop.xlane.xlu1 %484 }
 0x491   : > { %v486_v34 = vcvt.f32.s32 %v485_v32 }
 0x493   : > { %v489_v35 = vadd.s32 %v488_v33, %v486_v34 }
 0x494   : > { %v358_v41 = vpop.xlane.xlu1 %357 }
 0x495   : > { %vm490_vm13 = vcmp.eq.s32.totalorder %v743_v44, %v489_v35  ;;  %vm491_vm14 = vcmp.eq.s32.totalorder %v746_v45, %v489_v35  ;;  %360 = vst.msk [vmem:[%s205_s25] sm:$0xf] %vm359_vm15, %v358_v41 }
 0x496   : > { %v492_v36 = vsel %vm490_vm13, %v460_v12, %v447_v10  ;;  %v493_v37 = vsel %vm491_vm14, %v461_v13, %v448_v11 }
 0x497   : > { %v494_v38 = vsel %vm378_vm3, %v492_v36, -inf  ;;  %v495_v39 = vsel %vm378_vm3, %v493_v37, -inf }
 0x498   : > { %v496_v40 = vmax.f32 %v494_v38, %v495_v39 }
 0x49a   : > { %497 = vmax.xlane.f32.xlu0 %v496_v40 }
 0x527   : > { %v498_v43 = vpop.xlane.xlu0 %497 }
 0x528   : > { %v499_v44 = vadd.f32 %v498_v43, %v467_v42 }
 0x52a   : > { %v500_v45 = vmul.f32 0.33333334, %v499_v44 }
 0x52c   : > { %502 = vst.msk [vmem:[%s201_s28] sm:$0x1] %vm501_vm0, %v500_v45 }
 0x52d PF: > { %s14_s14 = sadd.s32 1, %s668_s14   ;;  %s792_s12 = smov %s664_s13 }
 0x52e   : > { %p11_p5 = scmp.ge.s32.totalorder %s14_s14, 4   ;;  %s793_s13 = smov %s795_s15 }
 0x530   :  { %13 = sbr.rel (!%p11_p5) target bundleno = 2 (0x2), region = 78 }

</bundles_post_ra>
